<compile_context>
chip_gen: v7x
topology: tpu7x:2x2x1
jax: 0.10.0
libtpu: 0.0.40
codegen_flags: <defaults>
</compile_context>

<pallas_src>
import functools

import jax
import jax.numpy as jnp
from jax.experimental import pallas as pl
from jax.experimental.pallas import tpu as pltpu


def _crelu_kernel(p_ref, w_ref, scale_ref, shift_ref, o_ref):
    # p_ref:     (1, K, HW)      bf16  im2col patches for one image
    # w_ref:     (Cout, K)       bf16  conv weight as a matrix
    # scale_ref: (Cout, 1)       f32   folded BN scale = gamma / sqrt(var+eps)
    # shift_ref: (Cout, 1)       f32   folded BN shift = beta - mean * scale
    # o_ref:     (1, 2*Cout, HW) f32
    cout = w_ref.shape[0]

    # Single lane-dense MXU matmul, f32 accumulation.
    y = jnp.dot(w_ref[...], p_ref[0],
                preferred_element_type=jnp.float32)        # (Cout, HW)

    # BatchNorm (inference) as fused per-channel scale/shift in f32.
    y = y * scale_ref[...] + shift_ref[...]

    # CReLU: cat([y, -y], channel) then relu == [relu(y), relu(-y)].
    # Two direct sublane-slice stores (no lane-axis concatenate).
    o_ref[0, :cout, :] = jnp.maximum(y, 0.0).astype(o_ref.dtype)
    o_ref[0, cout:, :] = jnp.maximum(-y, 0.0).astype(o_ref.dtype)


@functools.partial(jax.jit, static_argnames=("stride", "padding"))
def crelu_forward(x_nchw, w_oihw, gamma, beta, running_mean, running_var,
                  *, stride=1, padding=1, eps=1e-5):
    """x_nchw: (N, Cin, H, W) f32.  Returns (N, 2*Cout, Ho, Wo) f32."""
    assert stride == 1, "this synthetic instance uses stride=1"
    N, Cin, H, W = x_nchw.shape
    Cout, _, KH, KW = w_oihw.shape
    Ho = H + 2 * padding - KH + 1
    Wo = W + 2 * padding - KW + 1
    HW = Ho * Wo
    K = Cin * KH * KW

    # im2col in the wrapper (fused into the surrounding jit):
    # patches K axis ordered (Cin, KH, KW) to match w_oihw.reshape(Cout, K).
    xp = jnp.pad(x_nchw, ((0, 0), (0, 0),
                          (padding, padding), (padding, padding)))
    taps = [xp[:, :, kh:kh + Ho, kw:kw + Wo]
            for kh in range(KH) for kw in range(KW)]       # each (N,Cin,Ho,Wo)
    patches = jnp.stack(taps, axis=2)                      # (N,Cin,KH*KW,Ho,Wo)
    patches = patches.reshape(N, K, HW).astype(jnp.bfloat16)

    w_mat = w_oihw.reshape(Cout, K).astype(jnp.bfloat16)

    # Fold BN into per-channel scale/shift (kept in f32).
    inv_std = jax.lax.rsqrt(running_var.astype(jnp.float32) + eps)
    scale = (gamma * inv_std).reshape(Cout, 1).astype(jnp.float32)
    shift = (beta - running_mean * gamma * inv_std).reshape(Cout, 1)
    shift = shift.astype(jnp.float32)

    out = pl.pallas_call(
        _crelu_kernel,
        out_shape=jax.ShapeDtypeStruct((N, 2 * Cout, HW), jnp.float32),
        grid_spec=pltpu.PrefetchScalarGridSpec(
            num_scalar_prefetch=0,
            grid=(N,),
            in_specs=[
                pl.BlockSpec((1, K, HW), lambda n: (n, 0, 0)),
                pl.BlockSpec((Cout, K), lambda n: (0, 0)),
                pl.BlockSpec((Cout, 1), lambda n: (0, 0)),
                pl.BlockSpec((Cout, 1), lambda n: (0, 0)),
            ],
            out_specs=pl.BlockSpec((1, 2 * Cout, HW), lambda n: (n, 0, 0)),
        ),
        compiler_params=pltpu.CompilerParams(
            dimension_semantics=("parallel",)),
    )(patches, w_mat, scale, shift)

    # Lane-dense kernel output only needs a reshape (no transpose).
    return out.reshape(N, 2 * Cout, Ho, Wo)


def _reference(x_nchw, w_oihw, gamma, beta, mean, var, eps=1e-5):
    # Matches the kernel's deliberate bf16 matmul-operand rounding;
    # BN / CReLU in f32.
    xq = x_nchw.astype(jnp.bfloat16).astype(jnp.float32)
    wq = w_oihw.astype(jnp.bfloat16).astype(jnp.float32)
    y = jax.lax.conv_general_dilated(
        xq, wq, window_strides=(1, 1), padding=((1, 1), (1, 1)),
        dimension_numbers=("NCHW", "OIHW", "NCHW"))
    inv_std = jax.lax.rsqrt(var + eps)
    y = (y - mean[None, :, None, None]) * (gamma * inv_std)[None, :, None, None]
    y = y + beta[None, :, None, None]
    y = jnp.concatenate([y, -y], axis=1)
    return jnp.maximum(y, 0.0)


if __name__ == "__main__":
    key = jax.random.PRNGKey(0)
    k_x, k_w, k_g, k_b, k_m, k_v = jax.random.split(key, 6)

    N, Cin, H, W = 2, 4, 16, 16
    Cout, KH, KW = 8, 3, 3

    x = jax.random.normal(k_x, (N, Cin, H, W), jnp.float32)
    w = jax.random.normal(k_w, (Cout, Cin, KH, KW), jnp.float32) * 0.1
    gamma = 1.0 + 0.1 * jax.random.normal(k_g, (Cout,), jnp.float32)
    beta = 0.1 * jax.random.normal(k_b, (Cout,), jnp.float32)
    running_mean = 0.05 * jax.random.normal(k_m, (Cout,), jnp.float32)
    running_var = 1.0 + 0.1 * jax.random.uniform(k_v, (Cout,), jnp.float32)

    out = crelu_forward(x, w, gamma, beta, running_mean, running_var,
                        stride=1, padding=1)
    out = jax.block_until_ready(out)

    ref = _reference(x, w, gamma, beta, running_mean, running_var)
    assert out.shape == (N, 2 * Cout, H, W), out.shape
    assert jnp.allclose(out, ref, atol=2e-3, rtol=2e-3), "mismatch vs reference"

    print("KERNEL_OK")
</pallas_src>

<mosaic_0001>
module attributes {stable_mosaic.version = 11 : i64} {
  func.func @_crelu_kernel(%arg0: i32, %arg1: memref<1x36x256xbf16, #tpu.memory_space<vmem>>, %arg2: memref<8x36xbf16, #tpu.memory_space<vmem>>, %arg3: memref<8x1xf32, #tpu.memory_space<vmem>>, %arg4: memref<8x1xf32, #tpu.memory_space<vmem>>, %arg5: memref<1x16x256xf32, #tpu.memory_space<vmem>>) attributes {dimension_semantics = [#tpu.dimension_semantics<parallel>], iteration_bounds = array<i64: 2>, scalar_prefetch = 0 : i64, scratch_operands = 0 : i64, tpu.core_type = #tpu.core_type<tc>, window_params = [{transform_indices = @transform_0, window_bounds = array<i64: 1, 36, 256>}, {pipeline_mode = #tpu.pipeline_mode<synchronous>, transform_indices = @transform_1, window_bounds = array<i64: 8, 36>}, {pipeline_mode = #tpu.pipeline_mode<synchronous>, transform_indices = @transform_2, window_bounds = array<i64: 8, 1>}, {pipeline_mode = #tpu.pipeline_mode<synchronous>, transform_indices = @transform_3, window_bounds = array<i64: 8, 1>}, {transform_indices = @transform_4, window_bounds = array<i64: 1, 16, 256>}]} {
    %c0 = arith.constant 0 : index
    %c0_0 = arith.constant 0 : index
    %0 = vector.load %arg2[%c0, %c0_0] : memref<8x36xbf16, #tpu.memory_space<vmem>>, vector<8x36xbf16>
    %c0_1 = arith.constant 0 : index
    %c0_2 = arith.constant 0 : index
    %c0_3 = arith.constant 0 : index
    %1 = vector.load %arg1[%c0_1, %c0_2, %c0_3] : memref<1x36x256xbf16, #tpu.memory_space<vmem>>, vector<1x36x256xbf16>
    %2 = vector.shape_cast %1 : vector<1x36x256xbf16> to vector<36x256xbf16>
    %cst = arith.constant dense<0.000000e+00> : vector<8x256xf32>
    %3 = tpu.matmul %0, %2, %cst {dimension_numbers = #tpu.dot_dimension_numbers<[1], [0], [0], [1], [0, 0, 1, 1], [], []>} : vector<8x36xbf16>, vector<36x256xbf16>, vector<8x256xf32> -> vector<8x256xf32>
    %c0_4 = arith.constant 0 : index
    %c0_5 = arith.constant 0 : index
    %4 = vector.load %arg3[%c0_4, %c0_5] : memref<8x1xf32, #tpu.memory_space<vmem>>, vector<8x1xf32>
    %5 = vector.broadcast %4 : vector<8x1xf32> to vector<8x256xf32>
    %6 = arith.mulf %3, %5 : vector<8x256xf32>
    %c0_6 = arith.constant 0 : index
    %c0_7 = arith.constant 0 : index
    %7 = vector.load %arg4[%c0_6, %c0_7] : memref<8x1xf32, #tpu.memory_space<vmem>>, vector<8x1xf32>
    %8 = vector.broadcast %7 : vector<8x1xf32> to vector<8x256xf32>
    %9 = arith.addf %6, %8 : vector<8x256xf32>
    %cst_8 = arith.constant 0.000000e+00 : f32
    %10 = vector.broadcast %cst_8 : f32 to vector<8x256xf32>
    %11 = arith.maximumf %9, %10 : vector<8x256xf32>
    %c0_9 = arith.constant 0 : index
    %c0_10 = arith.constant 0 : index
    %c0_11 = arith.constant 0 : index
    %12 = vector.load %arg5[%c0_9, %c0_10, %c0_11] : memref<1x16x256xf32, #tpu.memory_space<vmem>>, vector<1x8x256xf32>
    %13 = vector.shape_cast %12 : vector<1x8x256xf32> to vector<8x256xf32>
    %14 = vector.shape_cast %11 : vector<8x256xf32> to vector<1x8x256xf32>
    tpu.vector_store %arg5[%c0_9, %c0_10, %c0_11], %14 {strides = array<i32>} : memref<1x16x256xf32, #tpu.memory_space<vmem>>, vector<1x8x256xf32>,
    %cst_12 = arith.constant 0.000000e+00 : f32
    %15 = vector.broadcast %cst_12 : f32 to vector<8x256xf32>
    %16 = arith.subf %15, %9 : vector<8x256xf32>
    %cst_13 = arith.constant 0.000000e+00 : f32
    %17 = vector.broadcast %cst_13 : f32 to vector<8x256xf32>
    %18 = arith.maximumf %16, %17 : vector<8x256xf32>
    %c0_14 = arith.constant 0 : index
    %c8 = arith.constant 8 : index
    %c0_15 = arith.constant 0 : index
    %19 = vector.load %arg5[%c0_14, %c8, %c0_15] : memref<1x16x256xf32, #tpu.memory_space<vmem>>, vector<1x8x256xf32>
    %20 = vector.shape_cast %19 : vector<1x8x256xf32> to vector<8x256xf32>
    %21 = vector.shape_cast %18 : vector<8x256xf32> to vector<1x8x256xf32>
    tpu.vector_store %arg5[%c0_14, %c8, %c0_15], %21 {strides = array<i32>} : memref<1x16x256xf32, #tpu.memory_space<vmem>>, vector<1x8x256xf32>,
    return
  }
  func.func @transform_0(%arg0: i32) -> (i32, i32, i32) {
    %c0_i32 = arith.constant 0 : i32
    %c0_i32_0 = arith.constant 0 : i32
    %c0_i32_1 = arith.constant 0 : i32
    return %arg0, %c0_i32, %c0_i32_0 : i32, i32, i32
  }
  func.func @transform_1(%arg0: i32) -> (i32, i32) {
    %c0_i32 = arith.constant 0 : i32
    %c0_i32_0 = arith.constant 0 : i32
    %c0_i32_1 = arith.constant 0 : i32
    return %c0_i32, %c0_i32_0 : i32, i32
  }
  func.func @transform_2(%arg0: i32) -> (i32, i32) {
    %c0_i32 = arith.constant 0 : i32
    %c0_i32_0 = arith.constant 0 : i32
    %c0_i32_1 = arith.constant 0 : i32
    return %c0_i32, %c0_i32_0 : i32, i32
  }
  func.func @transform_3(%arg0: i32) -> (i32, i32) {
    %c0_i32 = arith.constant 0 : i32
    %c0_i32_0 = arith.constant 0 : i32
    %c0_i32_1 = arith.constant 0 : i32
    return %c0_i32, %c0_i32_0 : i32, i32
  }
  func.func @transform_4(%arg0: i32) -> (i32, i32, i32) {
    %c0_i32 = arith.constant 0 : i32
    %c0_i32_0 = arith.constant 0 : i32
    %c0_i32_1 = arith.constant 0 : i32
    return %arg0, %c0_i32, %c0_i32_0 : i32, i32, i32
  }
}

</mosaic_0001>

<bundles_post_ra>
// kernel: crelu_forward.1
= control target key start
LH: loop header
LB: loop body
LE: loop exit
PB: predicated region body
PF: predicated region fallthrough
CT: control target
= control target key end

     0   :  { %s435_s15 = smov 0   ;;  %s465_s0 = inlined_call_operand.vmem [shape: bf16[2,36,256], index: 0, kind: input, shape index: {}]   ;;  %s466_s1 = inlined_call_operand.vmem [shape: bf16[8,36], index: 1, kind: input, shape index: {}]   ;;  %s467_s2 = inlined_call_operand.vmem [shape: f32[8,1], index: 2, kind: input, shape index: {}]   ;;  %s468_s3 = inlined_call_operand.vmem [shape: f32[8,1], index: 3, kind: input, shape index: {}]   ;;  %s469_s4 = inlined_call_operand.vmem [shape: f32[2,16,256], index: 4, kind: output, shape index: {}]  }
   0x1 LB: > { %s363_s16 = sadd.s32 4294967295, %s407_s15   ;;  %p367_p0 = scmp.ge.s32.totalorder %s407_s15, 1  ;;  %s407_s15 = sphi %s435_s15, %s14_s15  }
   0x2   : > { %p162_p1 = scmp.lt.s32.totalorder %s407_s15, 3 }
   0x4   : > { %p163_p2 = pnand %p367_p0, %p162_p1 }
   0x5   : > { %p188_p3 = scmp.lt.s32.totalorder (!%p163_p2), %s363_s16, 1  ;;  %v409_v0 = vmov (!%p163_p2), 0   ;;  %v282_v1 = vld [vmem:[%s467_s2] sm:$0xff] (!%p163_p2)  ;;  %vm234_vm0 = vcmask (!%p163_p2), 1041408   ;;  %vm230_vm1 = vcmask (!%p163_p2), 293888  }
   0x6   : > { %166 = sbr.rel (%p163_p2) target bundleno = 252 (0xfc), region = 36  ;;  %273 = vmatprep.mubr.bf16.mxu0 (!%p163_p2), %v409_v0  ;;  %392 = vset.pattern.permute.xlu0 (!%p163_p2), %v409_v0  ;;  %v290_v2 = vld [vmem:[%s468_s3] sm:$0xff] (!%p163_p2) }
   0x7   : > { %285 = vperm.xlu0 (!%p163_p2), %392, %v282_v1   ;;  %v199_v11 = vld [vmem:[%s466_s1] sm:$0xf] (!%p163_p2) }
   0xb   : > { %293 = vperm.xlu0 (!%p163_p2), %392, %v290_v2  }
   0xd   : > { %s471_s16 = smov (!%p188_p3, %s363_s16), 1 }
   0xe   : > { %s382_s21 = smul.u32 40, %s471_s16  ;;  %s381_s27 = sshll.u32 %s471_s16, 5 }
   0xf   : > { %s197_s30 = scalar_lea.vmem %s469_s4, %s381_s27 }
  0x10   : > { %s192_s24 = scalar_lea.vmem %s465_s0, %s382_s21 }
  0x11   : > { %v393_v3 = vld [vmem:[%s192_s24 + $0x4] ss:$8 sps:$4 sm:$0xff]   ;;  %v395_v4 = vld [vmem:[%s192_s24] ss:$8 sps:$4 sm:$0xff]   ;;  %v396_v5 = vld [vmem:[%s192_s24 + $0x14] ss:$8 sps:$4 sm:$0xff]  }
  0x12   : > { %241 = vmatprep.subr.bf16.mxu0 %v393_v3  ;;  %v204_v6 = vld [vmem:[%s192_s24 + $0x20] sm:$0x33]  ;;  %v398_v7 = vld [vmem:[%s192_s24 + $0x10] ss:$8 sps:$4 sm:$0xff]  }
  0x13   : > { %242 = vmatpush1.bf16.msra.mxu0 %v395_v4  ;;  %v376_v8 = vcombine.high %v204_v6, %v204_v6  ;;  %v375_v9 = vcombine.low %v204_v6, %v204_v6 }
  0x14   : > { %243 = vmatprep.subr.bf16.mxu0 %v396_v5 }
  0x15   : > { %v236_v10 = vsel %vm234_vm0, %v375_v9, 0 }
  0x17   : > { %244 = vmatpush1.bf16.msra.mxu0 %v398_v7 }
  0x18   : > { %377 = vmatprep.subr.msk.bf16.mxu0 %vm234_vm0, %v376_v8 }
  0x1b   : > { %246 = vmatpush1.bf16.msra.mxu0 %v236_v10 }
  0x1e   : > { %378 = vmatmul.mubr.msk.bf16.vlgmr.msra.gmra.mrb[0].mxu0 %vm230_vm1, %v199_v11 }
  0x86   : > { %v286_v12 = vpop.permute.xlu0 %285 }
  0x8a   : > { %v294_v16 = vpop.permute.xlu0 %293 }
  0xf1   : > { %v275_v13 = vpop.f32.mrb[0].mxu0 }
  0xf2   : > { %v288_v14 = vmul.f32 %v286_v12, %v275_v13  ;;  %v277_v15 = vpop.f32.mrb[1].mxu0 }
  0xf3   : > { %v289_v17 = vmul.f32 %v286_v12, %v277_v15  ;;  %v279_v18 = vpop.f32.mrb[2].mxu0 }
  0xf4   : > { %v296_v19 = vadd.f32 %v294_v16, %v288_v14  ;;  %v280_v20 = vpop.f32.mrb[3].mxu0 }
  0xf5   : > { %v297_v21 = vadd.f32 %v294_v16, %v289_v17 }
  0xf6   : > { %v298_v22 = vmax.f32 %v296_v19, 0.0  ;;  %v302_v23 = vsub.f32 0.0, %v296_v19 }
  0xf7   : > { %v299_v24 = vmax.f32 %v297_v21, 0.0  ;;  %v303_v25 = vsub.f32 0.0, %v297_v21 }
  0xf8   : > { %300 = vst [vmem:[%s197_s30] sm:$0xff] %v298_v22  ;;  %v304_v26 = vmax.f32 %v302_v23, 0.0 }
  0xf9   : > { %301 = vst [vmem:[%s197_s30 + $0x8] sm:$0xff] %v299_v24  ;;  %v305_v27 = vmax.f32 %v303_v25, 0.0 }
  0xfa   : > { %306 = vst [vmem:[%s197_s30 + $0x10] sm:$0xff] %v304_v26 }
  0xfb   : > { %307 = vst [vmem:[%s197_s30 + $0x18] sm:$0xff] %v305_v27 }
  0xfc PF: > { %s14_s15 = sadd.s32 1, %s407_s15  }
  0xfd   : > { %p11_p4 = scmp.ge.s32.totalorder %s14_s15, 4  }
  0xff   :  { %13 = sbr.rel (!%p11_p4) target bundleno = 1 (0x1), region = 66 }

</bundles_post_ra>
